<compile_context>
chip_gen: v5e
topology: v5e:2x2
jax: 0.10.0
libtpu: 0.0.40
codegen_flags: <defaults>
</compile_context>

<pallas_src>
import jax
import jax.numpy as jnp
from jax.experimental import pallas as pl
from jax.experimental.pallas import tpu as pltpu

LANES = 128          # lane width of a vreg
TILE_R = 4096        # rows per block: (4096, 128) f32 = 2 MiB per buffer
SPLIT_ROWS = 2048    # at/above this (and <= TILE_R) use 2 blocks for v7x megacore


def affine_kernel(wb_ref, x_ref, o_ref):
    # wb_ref: (2,) f32 in SMEM -> [w, b]. x_ref/o_ref: (tile_r, 128) VMEM tiles.
    w = wb_ref[0]
    b = wb_ref[1]
    o_ref[...] = x_ref[...] * w + b


def _round_up(n, m):
    return -(-n // m) * m


@jax.jit
def simple_model_forward(x, weight, bias):
    """x: (B, 1) f32; weight: (1, 1) f32; bias: (1,) f32  ->  (B, 1) f32."""
    B, F = x.shape
    assert F == 1
    # Pack [w, b] into one flat SMEM scalar array.
    wb = jnp.concatenate([weight.reshape(-1), bias.reshape(-1)]).astype(jnp.float32)

    # Lane-dense view: pack the B scalars into (rows, 128); rows a multiple of
    # 8 (sublane) only — never rounded to a TILE_R multiple (no dead pad traffic).
    rows = max(8, _round_up(pl.cdiv(B, LANES), 8))
    if rows > TILE_R:
        tile_r = TILE_R
    elif rows >= SPLIT_ROWS:
        # 2 blocks so dimension_semantics=("parallel",) can shard across both
        # TensorCores on v7x; negligible extra step cost elsewhere.
        tile_r = _round_up(pl.cdiv(rows, 2), 8)
    else:
        tile_r = rows  # single block == full array (always a legal block shape)
    grid = (pl.cdiv(rows, tile_r),)  # ragged last block handled by Pallas masking

    padded = rows * LANES
    x_flat = jnp.ravel(x).astype(jnp.float32)
    x_dense = jnp.pad(x_flat, (0, padded - B)).reshape(rows, LANES)

    y_dense = pl.pallas_call(
        affine_kernel,
        out_shape=jax.ShapeDtypeStruct((rows, LANES), jnp.float32),
        grid=grid,
        in_specs=[
            pl.BlockSpec(memory_space=pltpu.MemorySpace.SMEM),   # [w, b] scalars
            pl.BlockSpec((tile_r, LANES), lambda i: (i, 0)),     # lane-dense input tile
        ],
        out_specs=pl.BlockSpec((tile_r, LANES), lambda i: (i, 0)),
        compiler_params=pltpu.CompilerParams(
            dimension_semantics=("parallel",),
        ),
    )(wb, x_dense)

    # Drop padding, restore (B, 1) layout (fuses under jit).
    return y_dense.reshape(-1)[:B].reshape(B, 1)


if __name__ == "__main__":
    key = jax.random.PRNGKey(0)
    kx, kw, kb, kx2, kx3 = jax.random.split(key, 5)

    # Deterministic parameters consistent with nn.Linear(1, 1).
    weight = jax.random.uniform(kw, (1, 1), minval=-1.0, maxval=1.0, dtype=jnp.float32)
    bias = jax.random.uniform(kb, (1,), minval=-1.0, maxval=1.0, dtype=jnp.float32)

    # Small shape consistent with the module: batch=8, in_features=1.
    x = jax.random.normal(kx, (8, 1), dtype=jnp.float32)
    out = simple_model_forward(x, weight, bias)
    jax.block_until_ready(out)
    ref = x @ weight.T + bias
    assert out.shape == (8, 1)
    assert jnp.allclose(out, ref, atol=1e-6), "mismatch vs reference (B=8)"

    # Batch not a multiple of 128: exercises the lane-dense pad + slice path.
    x2 = jax.random.normal(kx2, (5000, 1), dtype=jnp.float32)
    out2 = simple_model_forward(x2, weight, bias)
    jax.block_until_ready(out2)
    ref2 = x2 @ weight.T + bias
    assert out2.shape == (5000, 1)
    assert jnp.allclose(out2, ref2, atol=1e-6), "mismatch vs reference (B=5000)"

    # Batch large enough for a multi-block grid with a ragged last block:
    # rows = 4104 > TILE_R -> grid = 2, last block only partially valid.
    B3 = TILE_R * LANES + 77
    x3 = jax.random.normal(kx3, (B3, 1), dtype=jnp.float32)
    out3 = simple_model_forward(x3, weight, bias)
    jax.block_until_ready(out3)
    ref3 = x3 @ weight.T + bias
    assert out3.shape == (B3, 1)
    assert jnp.allclose(out3, ref3, atol=1e-6), "mismatch vs reference (ragged grid)"

    print("KERNEL_OK")
</pallas_src>

<mosaic_0001>
module attributes {stable_mosaic.version = 11 : i64} {
  func.func @affine_kernel(%arg0: i32, %arg1: memref<2xf32, #tpu.memory_space<smem>>, %arg2: memref<8x128xf32, #tpu.memory_space<vmem>>, %arg3: memref<8x128xf32, #tpu.memory_space<vmem>>) attributes {dimension_semantics = [#tpu.dimension_semantics<parallel>], iteration_bounds = array<i64: 1>, scalar_prefetch = 0 : i64, scratch_operands = 0 : i64, tpu.core_type = #tpu.core_type<tc>, window_params = [{transform_indices = @transform_0, window_bounds = array<i64: 2>}, {transform_indices = @transform_1, window_bounds = array<i64: 8, 128>}, {transform_indices = @transform_2, window_bounds = array<i64: 8, 128>}]} {
    %c0 = arith.constant 0 : index
    %0 = memref.load %arg1[%c0] : memref<2xf32, #tpu.memory_space<smem>>
    %c1 = arith.constant 1 : index
    %1 = memref.load %arg1[%c1] : memref<2xf32, #tpu.memory_space<smem>>
    %c0_0 = arith.constant 0 : index
    %c0_1 = arith.constant 0 : index
    %2 = vector.load %arg2[%c0_0, %c0_1] : memref<8x128xf32, #tpu.memory_space<vmem>>, vector<8x128xf32>
    %3 = vector.broadcast %0 : f32 to vector<8x128xf32>
    %4 = arith.mulf %2, %3 : vector<8x128xf32>
    %5 = vector.broadcast %1 : f32 to vector<8x128xf32>
    %6 = arith.addf %4, %5 : vector<8x128xf32>
    %c0_2 = arith.constant 0 : index
    %c0_3 = arith.constant 0 : index
    %7 = vector.load %arg3[%c0_2, %c0_3] : memref<8x128xf32, #tpu.memory_space<vmem>>, vector<8x128xf32>
    tpu.vector_store %arg3[%c0_2, %c0_3], %6 {strides = array<i32>} : memref<8x128xf32, #tpu.memory_space<vmem>>, vector<8x128xf32>,
    return
  }
  func.func @transform_0(%arg0: i32) -> i32 {
    %c0_i32 = arith.constant 0 : i32
    %c0_i32_0 = arith.constant 0 : i32
    return %c0_i32 : i32
  }
  func.func @transform_1(%arg0: i32) -> (i32, i32) {
    %c0_i32 = arith.constant 0 : i32
    %c0_i32_0 = arith.constant 0 : i32
    return %arg0, %c0_i32 : i32, i32
  }
  func.func @transform_2(%arg0: i32) -> (i32, i32) {
    %c0_i32 = arith.constant 0 : i32
    %c0_i32_0 = arith.constant 0 : i32
    return %arg0, %c0_i32 : i32, i32
  }
}

</mosaic_0001>

<bundles_post_ra>
// kernel: simple_model_forward.1
= control target key start
LH: loop header
LB: loop body
LE: loop exit
PB: predicated region body
PF: predicated region fallthrough
CT: control target
= control target key end

     0   :  { %7 = vsyncpa [#allocation3], 0  ;;  %s53_s12 = smov [#allocation2]   ;;  %s78_s0 = inlined_call_operand.vmem [shape: f32[2], index: 0, kind: input, shape index: {}]   ;;  %s79_s1 = inlined_call_operand.vmem [shape: f32[8,128], index: 1, kind: input, shape index: {}]   ;;  %s80_s2 = inlined_call_operand.vmem [shape: f32[8,128], index: 2, kind: output, shape index: {}]  }
   0x1   :  { %s13_s11 = sshll.u32 %s78_s0, 4  ;;  %s14_s11 = int_to_ptr.vmem [resolvable:$true] %s13_s11 }
   0x2   :  { %16 = dma.vmem_to_smem %s14_s11, 16, %s53_s12, [#allocation3]  }
   0x3   :  { %51 = dma.done.wait [#allocation3], 16  }
   0x4   :  { %52 = vsyncadd [#allocation3], 4294967280 }
   0x5   :  { %23 = sfence }
   0x6   :  { %s24_s13 = sld [smem:[#allocation2]]  ;;  %v26_v0 = vld [vmem:[%s79_s1] sm:$0xff] }
   0x7   :  { %s37_s14 = sld [smem:[#allocation2 + $0x1]] }
   0xc   :  { %v27_v1 = vstv %s24_s13 }
   0xd   :  { %v28_v2 = vmul.f32 %v27_v1, %v26_v0  ;;  %v29_v3 = vstv %s37_s14 }
   0xf   :  { %v30_v4 = vadd.f32 %v29_v3, %v28_v2 }
  0x11   :  { %31 = vst [vmem:[%s80_s2] sm:$0xff] %v30_v4 }
  0x12   :  { %36 = vsyncpa [#allocation3], 1 }

</bundles_post_ra>
